<compile_context>
chip_gen: v6e
topology: v6e:2x2x1
jax: 0.10.0
libtpu: 0.0.40
codegen_flags: <defaults>
</compile_context>

<pallas_src>
from functools import partial

import jax
import jax.numpy as jnp
from jax.experimental import pallas as pl
from jax.experimental.pallas import tpu as pltpu

_I32_MAX = jnp.iinfo(jnp.int32).max


# ---------------------------------------------------------------------------
# Trace-time hardware queries (best effort; conservative fallbacks).
# ---------------------------------------------------------------------------
def _tpu_vmem_bytes() -> int:
    try:
        return int(pltpu.get_tpu_info().vmem_capacity_bytes)
    except Exception:
        return 64 * 1024 * 1024          # v7x floor -> safe on every generation


def _tpu_generation() -> int:
    """Best-effort TPU generation number (5 for v5e, 6 for v6e, 7 for v7x)."""
    try:
        kind = jax.devices()[0].device_kind          # e.g. "TPU v6e"
        digits = "".join(c for c in kind if c.isdigit())
        if digits:
            return int(digits[0])
    except Exception:
        pass
    return 6                                          # assume bf16-capable VPU


# ---------------------------------------------------------------------------
# In-kernel row-wise (max, argmax) over the lane axis of the current block.
# ---------------------------------------------------------------------------
def _narrow_max_argmax(x):
    """x: (rows, w<=128). Returns ((rows,1) max, (rows,1) int32 first-occurrence idx)."""
    m = jnp.max(x, axis=-1, keepdims=True)
    lane = jax.lax.broadcasted_iota(jnp.int32, x.shape, 1)
    idx = jnp.min(jnp.where(x == m, lane, _I32_MAX), axis=-1, keepdims=True)
    return m, idx


def _chunk_row_argmax(lp_ref, compute_dtype):
    """Single-pass row (max, argmax) over the current block's columns.

    128-lane strips with a running (max, strip_base) carry (strict-greater
    updates -> first occurrence wins), one final cross-lane reduce pair on a
    single vreg per 8-row group.  Indices are local to this block.
    """
    rows, width = lp_ref.shape

    def cast(x):
        return x if x.dtype == compute_dtype else x.astype(compute_dtype)

    if width <= 128:
        return _narrow_max_argmax(cast(lp_ref[...]))

    n_full = width // 128
    run_max = cast(lp_ref[:, 0:128])
    run_base = jnp.zeros((rows, 128), jnp.int32)
    for s in range(1, n_full):                        # unrolled: LLO visibility
        b = s * 128
        strip = cast(lp_ref[:, b:b + 128])            # lane-tile-aligned load
        better = strip > run_max                      # strict -> keep earliest
        run_max = jnp.where(better, strip, run_max)
        run_base = jnp.where(better, jnp.int32(b), run_base)

    m = jnp.max(run_max, axis=-1, keepdims=True)
    lane = jax.lax.broadcasted_iota(jnp.int32, run_max.shape, 1)
    idx = jnp.min(jnp.where(run_max == m, run_base + lane, _I32_MAX),
                  axis=-1, keepdims=True)

    rem = width - n_full * 128
    if rem:                                           # aligned remainder strip
        m2, i2 = _narrow_max_argmax(cast(lp_ref[:, n_full * 128:width]))
        take2 = m2 > m                                # strict -> earlier cols win ties
        m = jnp.where(take2, m2, m)
        idx = jnp.where(take2, i2 + n_full * 128, idx)
    return m, idx


# ---------------------------------------------------------------------------
# Kernels.
# ---------------------------------------------------------------------------
def _decode_kernel_single(lp_ref, out_ref, *, compute_dtype):
    """Whole class axis in one block: emit the argmax column directly."""
    _, idx = _chunk_row_argmax(lp_ref, compute_dtype)
    out_ref[...] = idx


def _decode_kernel_chunked(lp_ref, out_ref, max_sc, idx_sc, *, d_chunk, compute_dtype):
    """Class axis split over the (arbitrary) second grid axis with carried scratch."""
    k = pl.program_id(1)

    @pl.when(k == 0)
    def _init():
        max_sc[...] = jnp.full(max_sc.shape, -jnp.inf, max_sc.dtype)
        idx_sc[...] = jnp.zeros(idx_sc.shape, idx_sc.dtype)

    cmax, cidx = _chunk_row_argmax(lp_ref, compute_dtype)
    better = cmax > max_sc[...]                       # strict: lower chunk wins ties
    max_sc[...] = jnp.where(better, cmax, max_sc[...])
    idx_sc[...] = jnp.where(better, cidx + k * d_chunk, idx_sc[...])

    @pl.when(k == pl.num_programs(1) - 1)
    def _finalize():
        out_ref[...] = idx_sc[...]


# ---------------------------------------------------------------------------
# Tiling heuristics.
# ---------------------------------------------------------------------------
def _round_down(x, m):
    return max(m, (x // m) * m)


def _choose_d_chunk(d, itemsize, per_buf_target, d_chunk_cap):
    """Chunk width along the class axis (equal, 128-multiple chunks or full D)."""
    max_bytes = max(128 * itemsize, per_buf_target // 8)   # keep >= 8 rows per tile
    max_lanes = max(128, (max_bytes // max(1, itemsize)) // 128 * 128)
    if d_chunk_cap is not None:
        max_lanes = min(max_lanes, max(128, (int(d_chunk_cap) // 128) * 128))
    if d <= max_lanes:
        return d
    if d % 128 != 0:
        # TODO(synk): masked partial chunks for huge class counts that are not
        # multiples of 128; fall back to one full-width chunk (rows shrink).
        return d
    n128 = d // 128
    best = 128
    for c in range(1, n128 + 1):
        w = c * 128
        if w <= max_lanes and n128 % c == 0:
            best = w
    return best


def _choose_rows_tile(n_rows, chunk_bytes_per_row, per_buf_target, rows_cap):
    rows = max(8, per_buf_target // max(1, chunk_bytes_per_row))
    if n_rows >= 32:
        # keep >= 4 row tiles so v7x's two TensorCores each get >= 2 grid steps
        rows = min(rows, max(8, -(-n_rows // 4)))
    if rows_cap is not None:
        rows = min(rows, max(8, int(rows_cap)))
    if rows >= n_rows:
        return n_rows                                  # single full-extent block
    return _round_down(rows, 128) if rows >= 128 else _round_down(rows, 8)


# ---------------------------------------------------------------------------
# Public wrapper: EncoderModel.decode()  ==  argmax over the last axis.
# ---------------------------------------------------------------------------
@partial(jax.jit, static_argnames=("rows_cap", "d_chunk_cap"))
def pallas_decode(predicted_log_probs, *, rows_cap=None, d_chunk_cap=None):
    """(batch, seq_length, dimension) float -> (batch, seq_length) int32 argmax."""
    b, t, d = predicted_log_probs.shape
    n_rows = b * t
    lp2 = predicted_log_probs.reshape(n_rows, d)       # free contiguous view

    in_dtype = lp2.dtype
    itemsize = in_dtype.itemsize
    gen = _tpu_generation()
    vmem_cap = _tpu_vmem_bytes()
    per_buf_target = int(min(8 * 1024 * 1024, vmem_cap // 8))

    # v6e/v7x VPU handles bf16 natively: compare in the HBM dtype (half the VPU
    # work, no f32 tile copy).  v5e (no bf16 VALU) and f16 inputs upcast in-VMEM.
    if in_dtype == jnp.float32:
        compute_dtype = jnp.float32
    elif in_dtype == jnp.bfloat16 and gen >= 6:
        compute_dtype = jnp.bfloat16
    else:
        compute_dtype = jnp.float32

    d_chunk = _choose_d_chunk(d, itemsize, per_buf_target, d_chunk_cap)
    num_chunks = d // d_chunk if d % d_chunk == 0 else 1
    if num_chunks == 1:
        d_chunk = d
    rows_tile = _choose_rows_tile(n_rows, d_chunk * itemsize, per_buf_target, rows_cap)
    num_row_tiles = pl.cdiv(n_rows, rows_tile)

    in_buf_bytes = rows_tile * d_chunk * itemsize
    vmem_limit = int(min(vmem_cap * 3 // 4, max(32 * 1024 * 1024, 4 * in_buf_bytes)))
    cost = pl.CostEstimate(flops=2 * n_rows * d, transcendentals=0,
                           bytes_accessed=n_rows * d * itemsize + n_rows * 4)

    if num_chunks == 1:
        out2 = pl.pallas_call(
            partial(_decode_kernel_single, compute_dtype=compute_dtype),
            out_shape=jax.ShapeDtypeStruct((n_rows, 1), jnp.int32),
            grid=(num_row_tiles,),
            in_specs=[pl.BlockSpec((rows_tile, d), lambda i: (i, 0))],
            out_specs=pl.BlockSpec((rows_tile, 1), lambda i: (i, 0)),
            compiler_params=pltpu.CompilerParams(
                dimension_semantics=("parallel",),      # v7x megacore over row tiles
                vmem_limit_bytes=vmem_limit),
            cost_estimate=cost,
        )(lp2)
    else:
        out2 = pl.pallas_call(
            partial(_decode_kernel_chunked, d_chunk=d_chunk,
                    compute_dtype=compute_dtype),
            out_shape=jax.ShapeDtypeStruct((n_rows, 1), jnp.int32),
            grid=(num_row_tiles, num_chunks),
            in_specs=[pl.BlockSpec((rows_tile, d_chunk), lambda i, k: (i, k))],
            out_specs=pl.BlockSpec((rows_tile, 1), lambda i, k: (i, 0)),
            scratch_shapes=[pltpu.VMEM((rows_tile, 1), compute_dtype),
                            pltpu.VMEM((rows_tile, 1), jnp.int32)],
            compiler_params=pltpu.CompilerParams(
                dimension_semantics=("parallel", "arbitrary"),
                vmem_limit_bytes=vmem_limit),
            cost_estimate=cost,
        )(lp2)

    return out2.reshape(b, t)


# ---------------------------------------------------------------------------
# JAX/Pallas mirror of the (abstract) PyTorch EncoderModel.
# ---------------------------------------------------------------------------
class EncoderModelPallas:
    def __init__(self):
        self.decoder = None          # the reference __init__ owns no parameters

    def set_decoder(self, decoder):
        self.decoder = decoder

    def count_parameters(self):
        return 0                     # abstract base owns no parameters

    def update_dropout(self, dropout_p):
        pass                         # no Dropout children in the abstract base

    def forward(self, inputs, input_lengths):
        # Mirrors the abstract base class exactly.
        raise NotImplementedError

    def decode(self, predicted_log_probs):
        return pallas_decode(predicted_log_probs)

    def recognize(self, predicted_log_probs, input_lengths):
        # TODO(synk): forward() is abstract in the source module; recognize()
        # here decodes already-computed log-probabilities.
        if self.decoder is not None:
            return self.decoder.decode(predicted_log_probs)
        return self.decode(predicted_log_probs)


if __name__ == "__main__":
    key = jax.random.PRNGKey(0)
    ks = jax.random.split(key, 4)
    model = EncoderModelPallas()

    def check(name, log_probs, **kw):
        pred = jax.block_until_ready(pallas_decode(log_probs, **kw))
        ref = jnp.argmax(log_probs, axis=-1).astype(jnp.int32)
        assert pred.shape == ref.shape, (name, pred.shape, ref.shape)
        assert bool(jnp.all(pred == ref)), f"Pallas decode mismatch: {name}"

    # 1) Tiny docstring shape (batch, seq, dimension): single full-extent tile,
    #    narrow (D < 128) path, exercised through recognize().
    b1, t1, d1 = 2, 8, 32
    lp1 = jax.nn.log_softmax(
        jax.random.normal(ks[0], (b1, t1, d1), jnp.float32), axis=-1)
    lens1 = jnp.full((b1,), t1, dtype=jnp.int32)
    pred1 = jax.block_until_ready(model.recognize(lp1, lens1))
    ref1 = jnp.argmax(lp1, axis=-1).astype(jnp.int32)
    assert pred1.shape == (b1, t1), pred1.shape
    assert bool(jnp.all(pred1 == ref1)), "Pallas decode mismatch: recognize f32 small"

    # 2) bf16 native-dtype compare path, multi-row-tile grid with uneven last
    #    tile, 3 full 128-lane strips.
    lp2 = jax.nn.log_softmax(
        jax.random.normal(ks[1], (4, 160, 384), jnp.float32), axis=-1
    ).astype(jnp.bfloat16)
    check("bf16 D=384 tiled", lp2)

    # 3) D not a multiple of 128: aligned strips + remainder combine.
    lp3 = jax.nn.log_softmax(
        jax.random.normal(ks[2], (3, 64, 320), jnp.float32), axis=-1)
    check("f32 D=320 remainder", lp3)

    # 4) Forced class-axis chunking (vocab-split path): 2 chunks of 512 using
    #    the carried (running max, running argmax) scratch accumulator.
    lp4 = jax.nn.log_softmax(
        jax.random.normal(ks[3], (2, 96, 1024), jnp.float32), axis=-1)
    check("f32 D=1024 chunked", lp4, d_chunk_cap=512, rows_cap=64)

    print("KERNEL_OK")
</pallas_src>

<mosaic_0001>
module attributes {stable_mosaic.version = 11 : i64} {
  func.func @_decode_kernel_single(%arg0: i32, %arg1: memref<16x32xf32, #tpu.memory_space<vmem>>, %arg2: memref<16x1xi32, #tpu.memory_space<vmem>>) attributes {dimension_semantics = [#tpu.dimension_semantics<parallel>], iteration_bounds = array<i64: 1>, scalar_prefetch = 0 : i64, scratch_operands = 0 : i64, tpu.core_type = #tpu.core_type<tc>, window_params = [{transform_indices = @transform_0, window_bounds = array<i64: 16, 32>}, {transform_indices = @transform_1, window_bounds = array<i64: 16, 1>}]} {
    %c0 = arith.constant 0 : index
    %c0_0 = arith.constant 0 : index
    %0 = vector.load %arg1[%c0, %c0_0] : memref<16x32xf32, #tpu.memory_space<vmem>>, vector<16x32xf32>
    %cst = arith.constant dense<0xFF800000> : vector<16xf32>
    %1 = vector.multi_reduction <maximumf>, %0, %cst [1] : vector<16x32xf32> to vector<16xf32>
    %2 = vector.shape_cast %1 : vector<16xf32> to vector<16x1xf32>
    %3 = tpu.iota {dimensions = array<i32: 1>} : vector<16x32xi32>
    %4 = vector.broadcast %2 : vector<16x1xf32> to vector<16x32xf32>
    %5 = arith.cmpf oeq, %0, %4 : vector<16x32xf32>
    %c2147483647_i32 = arith.constant 2147483647 : i32
    %6 = vector.broadcast %c2147483647_i32 : i32 to vector<16x32xi32>
    %7 = arith.select %5, %3, %6 : vector<16x32xi1>, vector<16x32xi32>
    %cst_1 = arith.constant dense<2147483647> : vector<16xi32>
    %8 = vector.multi_reduction <minsi>, %7, %cst_1 [1] : vector<16x32xi32> to vector<16xi32>
    %9 = vector.shape_cast %8 : vector<16xi32> to vector<16x1xi32>
    %c0_2 = arith.constant 0 : index
    %c0_3 = arith.constant 0 : index
    %10 = vector.load %arg2[%c0_2, %c0_3] : memref<16x1xi32, #tpu.memory_space<vmem>>, vector<16x1xi32>
    tpu.vector_store %arg2[%c0_2, %c0_3], %9 {strides = array<i32>} : memref<16x1xi32, #tpu.memory_space<vmem>>, vector<16x1xi32>,
    return
  }
  func.func @transform_0(%arg0: i32) -> (i32, i32) {
    %c0_i32 = arith.constant 0 : i32
    %c0_i32_0 = arith.constant 0 : i32
    return %arg0, %c0_i32 : i32, i32
  }
  func.func @transform_1(%arg0: i32) -> (i32, i32) {
    %c0_i32 = arith.constant 0 : i32
    %c0_i32_0 = arith.constant 0 : i32
    return %arg0, %c0_i32 : i32, i32
  }
}

</mosaic_0001>

<bundles_post_ra>
// kernel: pallas_decode.1
= control target key start
LH: loop header
LB: loop body
LE: loop exit
PB: predicated region body
PF: predicated region fallthrough
CT: control target
= control target key end

     0   :  { %6 = vsyncpa [#allocation3], 0  ;;  %s100_s6 = smov [#allocation2]   ;;  %s126_s0 = inlined_call_operand.hbm [shape: f32[16,32], index: 0, kind: input, shape index: {}]   ;;  %s127_s1 = inlined_call_operand.vmem [shape: s32[16,1], index: 1, kind: output, shape index: {}]  }
   0x1   :  { %s12_s7 = sshll.u32 %s100_s6, 4  ;;  %s13_s7 = int_to_ptr.vmem [resolvable:$true] %s12_s7 }
   0x2   :  { %s86_s8 = scalar_lea.vmem %s13_s7, 256  ;;  %p91_p1 = scmp.lt.s32.totalorder %s13_s7, %s13_s7 }
   0x3   :  { %p87_p0 = scmp.ne.s32.totalorder %s13_s7, %s86_s8  ;;  %p92_p2 = scmp.lt.s32.totalorder %s86_s8, %s86_s8 }
   0x5   :  { %p93_p3 = por %p92_p2, %p91_p1 }
   0x7   :  { %p94_p4 = pnand %p93_p3, %p87_p0 }
   0x9   :  { %97 = shalt.err (!%p94_p4)
}
   0xa   :  { %s101_s9 = smov 128   ;;  %s102_s10 = smov 8  }
   0xb   :  { %18 = dma.hbm_to_vmem [thread:$0]  %s126_s0, 256, %s13_s7, [#allocation3], %s101_s9, %s101_s9, %s102_s10  }
   0xc   :  { %98 = dma.done.wait [#allocation3], 256  }
   0xd   :  { %99 = vsyncadd [#allocation3], 4294967040  ;;  %vm24_vm0 = vcmask 261120   ;;  %v22_v0 = vld [vmem:[#allocation2] sm:$0xff]  ;;  %v23_v1 = vld [vmem:[#allocation2 + $0x8] sm:$0xff]  ;;  %v31_v4 = vlaneseq  ;;  %vm67_vm5 = vcmask 7168  }
   0xe   :  { %v25_v2 = vsel %vm24_vm0, %v22_v0, -inf  ;;  %v28_v3 = vsel %vm24_vm0, %v23_v1, -inf }
   0xf   :  { %26 = vmax.xlane.f32.xlu0 %v25_v2  ;;  %v32_v5 = vand.u32 127, %v31_v4 }
  0x13   :  { %29 = vmax.xlane.f32.xlu0 %v28_v3 }
  0x98   :  { %v27_v6 = vpop.xlane.xlu0 %26 }
  0x99   :  { %vm33_vm1 = vcmp.eq.f32.partialorder %v22_v0, %v27_v6 }
  0x9a   :  { %v35_v7 = vsel %vm33_vm1, %v32_v5, 2147483647 }
  0x9b   :  { %v37_v8 = vsel %vm24_vm0, %v35_v7, 2147483647 }
  0x9c   :  { %v30_v9 = vpop.xlane.xlu0 %29  ;;  %v39_v10 = vshra.s32 %v37_v8, 16  ;;  %v38_v16 = vand.u32 65535, %v37_v8 }
  0x9d   :  { %vm34_vm2 = vcmp.eq.f32.partialorder %v23_v1, %v30_v9 }
  0x9e   :  { %v36_v11 = vsel %vm34_vm2, %v32_v5, 2147483647  ;;  %v41_v12 = vcvt.s32.f32 %v39_v10  ;;  %v40_v18 = vcvt.s32.f32 %v38_v16 }
  0x9f   :  { %v52_v13 = vsel %vm24_vm0, %v36_v11, 2147483647 }
  0xa0   :  { %42 = vmin.xlane.f32.xlu1 %v41_v12  ;;  %v54_v14 = vshra.s32 %v52_v13, 16  ;;  %v53_v19 = vand.u32 65535, %v52_v13 }
  0xa2   :  { %v56_v15 = vcvt.s32.f32 %v54_v14  ;;  %v55_v22 = vcvt.s32.f32 %v53_v19 }
  0xa4   :  { %57 = vmin.xlane.f32.xlu1 %v56_v15 }
 0x129   :  { %v43_v17 = vpop.xlane.xlu1 %42 }
 0x12a   :  { %vm44_vm3 = vcmp.eq.f32.partialorder %v41_v12, %v43_v17  ;;  %v49_v24 = vcvt.f32.s32 %v43_v17 }
 0x12b   :  { %v45_v20 = vsel %vm44_vm3, %v40_v18, inf }
 0x12c   :  { %46 = vmin.xlane.f32.xlu0 %v45_v20  ;;  %v50_v26 = vshll.u32 %v49_v24, 16 }
 0x12d   :  { %v58_v21 = vpop.xlane.xlu1 %57 }
 0x12e   :  { %vm59_vm4 = vcmp.eq.f32.partialorder %v56_v15, %v58_v21  ;;  %v64_v27 = vcvt.f32.s32 %v58_v21 }
 0x12f   :  { %v60_v23 = vsel %vm59_vm4, %v55_v22, inf }
 0x130   :  { %61 = vmin.xlane.f32.xlu1 %v60_v23  ;;  %v65_v31 = vshll.u32 %v64_v27, 16 }
 0x1b5   :  { %v47_v25 = vpop.xlane.xlu0 %46 }
 0x1b6   :  { %v48_v28 = vcvt.f32.s32 %v47_v25 }
 0x1b8   :  { %v51_v29 = vadd.s32 %v50_v26, %v48_v28 }
 0x1b9   :  { %v62_v30 = vpop.xlane.xlu1 %61 }
 0x1ba   :  { %68 = vst.msk [vmem:[%s127_s1] sm:$0xff] %vm67_vm5, %v51_v29  ;;  %v63_v32 = vcvt.f32.s32 %v62_v30 }
 0x1bc   :  { %v66_v33 = vadd.s32 %v65_v31, %v63_v32 }
 0x1be   :  { %69 = vst.msk [vmem:[%s127_s1 + $0x8] sm:$0xff] %vm67_vm5, %v66_v33 }
 0x1bf   :  { %74 = vsyncpa [#allocation3], 1 }

</bundles_post_ra>
